<compile_context>
chip_gen: v6e
topology: v6e:2x2x1
jax: 0.10.0
libtpu: 0.0.40
codegen_flags: <defaults>
</compile_context>

<pallas_src>
import jax
import jax.numpy as jnp
from jax.experimental import pallas as pl
from jax.experimental.pallas import tpu as pltpu


# ----------------------------- helpers ------------------------------------- #
_VMEM_BUDGET = 40 * 1024 * 1024      # block footprint budget (fits v7x 64 MiB/TC)
_VMEM_LIMIT_CAP = 64 * 1024 * 1024   # never ask for more than v7x physical VMEM


def _round_up(x: int, m: int) -> int:
    return (x + m - 1) // m * m


def _pick_tile(dim: int, preferred: int, align: int) -> int:
    """Largest tile (multiple of `align`, <= preferred) minimizing padding of `dim`."""
    dim_al = _round_up(dim, align)
    if dim_al <= preferred:
        return dim_al
    best_t, best_pad = align, _round_up(dim, align)
    t = 2 * align
    while t <= preferred:
        p = _round_up(dim, t)
        if p <= best_pad:          # ties -> larger tile (fewer grid steps)
            best_t, best_pad = t, p
        t += align
    return best_t


def _block_footprint(num_names, tm, tn, tk, k_steps, x_isz, w_isz, o_isz) -> int:
    """Per-grid-step VMEM bytes: double-buffered x/W/b/out + f32 accumulator."""
    acc = num_names * tm * tn * 4 if k_steps > 1 else 0
    return (num_names * 2 * tm * tk * x_isz      # x blocks (double-buffered)
            + 2 * tk * tn * w_isz                # W block   (double-buffered)
            + 2 * 8 * tn * 4                     # bias block (sublane-padded)
            + num_names * 2 * tm * tn * o_isz    # out blocks (double-buffered)
            + acc)


def _choose_blocks(num_names, M, K, N, tile_m, tile_n, x_isz, w_isz, o_isz):
    """Pick (tm, tn, tk, k_steps) so the block footprint fits the VMEM budget."""
    tm = _pick_tile(M, tile_m, 8)
    tn = _pick_tile(N, tile_n, 128)
    while True:
        k_full = _round_up(K, 128)
        if _block_footprint(num_names, tm, tn, k_full, 1,
                            x_isz, w_isz, o_isz) <= _VMEM_BUDGET:
            return tm, tn, k_full, 1
        for tk in (2048, 1024, 512, 256, 128):       # K tiling (pattern P3)
            if tk >= k_full:
                continue
            k_steps = _round_up(K, tk) // tk
            if _block_footprint(num_names, tm, tn, tk, k_steps,
                                x_isz, w_isz, o_isz) <= _VMEM_BUDGET:
                return tm, tn, tk, k_steps
        if tn > 128:
            tn = max(128, _round_up(tn // 2, 128))
        elif tm > 8:
            tm = max(8, _round_up(tm // 2, 8))
        else:
            return tm, tn, 128, _round_up(K, 128) // 128


# ----------------------------- Pallas kernels ------------------------------ #
def _make_fullk_kernel(num_names):
    """Full-K blocks: one MXU matmul + bias per name, per (D_out, M) tile."""
    def kernel(*refs):
        x_refs = refs[:num_names]
        w_ref = refs[num_names]
        b_ref = refs[num_names + 1]
        o_refs = refs[num_names + 2:]
        w = w_ref[...]
        bias = b_ref[...]
        for x_ref, o_ref in zip(x_refs, o_refs):
            acc = jnp.dot(x_ref[...], w, preferred_element_type=jnp.float32)
            o_ref[...] = (acc + bias).astype(o_ref.dtype)
    return kernel


def _make_ktiled_kernel(num_names):
    """K-tiled path: f32 accumulator scratch, pl.when init/finalize (P3)."""
    def kernel(*refs):
        x_refs = refs[:num_names]
        w_ref = refs[num_names]
        b_ref = refs[num_names + 1]
        o_refs = refs[num_names + 2: 2 * num_names + 2]
        acc_ref = refs[2 * num_names + 2]
        k = pl.program_id(2)

        @pl.when(k == 0)
        def _():
            acc_ref[...] = jnp.zeros_like(acc_ref)

        w = w_ref[...]
        for n, x_ref in enumerate(x_refs):
            acc_ref[n] = acc_ref[n] + jnp.dot(
                x_ref[...], w, preferred_element_type=jnp.float32)

        @pl.when(k == pl.num_programs(2) - 1)
        def _():
            bias = b_ref[...]
            for n, o_ref in enumerate(o_refs):
                o_ref[...] = (acc_ref[n] + bias).astype(o_ref.dtype)
    return kernel


# ----------------------------- wrapper -------------------------------------- #
def fused_linear_pallas(xs, w, b, *, tile_m: int = 256, tile_n: int = 512,
                        out_dtype=jnp.bfloat16):
    """y_n = xs[n] @ w + b for all n, in ONE Pallas TPU call (no concat copy).

    xs: list of [M, D_in] (bf16, same shape/dtype)   w: [D_in, D_out] (bf16)
    b: [1, D_out] (f32)   ->   list of [M, D_out] (out_dtype)
    """
    xs = list(xs)
    num_names = len(xs)
    M, K = xs[0].shape
    K_w, N = w.shape
    assert K == K_w and b.shape == (1, N)
    for x in xs:
        assert x.shape == (M, K) and x.dtype == xs[0].dtype

    x_isz = xs[0].dtype.itemsize
    w_isz = w.dtype.itemsize
    o_isz = jnp.dtype(out_dtype).itemsize

    tm, tn, tk, k_steps = _choose_blocks(num_names, M, K, N, tile_m, tile_n,
                                         x_isz, w_isz, o_isz)
    M_pad = _round_up(M, tm)
    N_pad = _round_up(N, tn)
    K_pad = tk * k_steps

    # v7x megacore: keep >= 2 program instances on a "parallel" axis when
    # possible so one of the two TensorCores is not idle on small fused M.
    if (N_pad // tn) * (M_pad // tm) == 1:
        if tn >= 256:
            tn //= 2
        elif tm >= 16 and tm % 16 == 0:
            tm //= 2

    n_j = N_pad // tn          # D_out tiles (outer)
    n_i = M_pad // tm          # M tiles (inner)

    # Zero-pad to tile multiples (zeros on K are exact; padded M/N rows/cols
    # are sliced off below).  Replaces the old full-extent fallback.
    def _pad2(a, rows, cols):
        pr, pc = rows - a.shape[0], cols - a.shape[1]
        return jnp.pad(a, ((0, pr), (0, pc))) if (pr or pc) else a

    xs_p = [_pad2(x, M_pad, K_pad) for x in xs]
    w_p = _pad2(w, K_pad, N_pad)
    b_p = _pad2(b, 1, N_pad)

    # Accurate advisory cost: x is re-read once per D_out tile, W once per M tile.
    cost = pl.CostEstimate(
        flops=2 * num_names * M_pad * K_pad * N_pad,
        transcendentals=0,
        bytes_accessed=(num_names * n_j * M_pad * K_pad * x_isz
                        + n_i * K_pad * N_pad * w_isz
                        + N_pad * 4
                        + num_names * M_pad * N_pad * o_isz),
    )

    foot = _block_footprint(num_names, tm, tn, tk, k_steps, x_isz, w_isz, o_isz)
    vmem_limit = int(min(max(foot + 16 * 1024 * 1024, 32 * 1024 * 1024),
                         _VMEM_LIMIT_CAP))

    out_shape = tuple(jax.ShapeDtypeStruct((M_pad, N_pad), out_dtype)
                      for _ in range(num_names))

    if k_steps == 1:
        # Grid (D_out tiles, M tiles): W/b block index depends only on the
        # outer axis -> resident across the inner M loop (no re-DMA).
        grid = (n_j, n_i)
        in_specs = (
            [pl.BlockSpec((tm, K_pad), lambda j, i: (i, 0))
             for _ in range(num_names)]
            + [pl.BlockSpec((K_pad, tn), lambda j, i: (0, j)),
               pl.BlockSpec((1, tn), lambda j, i: (0, j))])
        out_specs = tuple(pl.BlockSpec((tm, tn), lambda j, i: (i, j))
                          for _ in range(num_names))
        kernel = _make_fullk_kernel(num_names)
        scratch_shapes = []
        dims = ("parallel", "parallel")
    else:
        # K axis innermost and "arbitrary"; f32 accumulator scratch per name.
        grid = (n_j, n_i, k_steps)
        in_specs = (
            [pl.BlockSpec((tm, tk), lambda j, i, k: (i, k))
             for _ in range(num_names)]
            + [pl.BlockSpec((tk, tn), lambda j, i, k: (k, j)),
               pl.BlockSpec((1, tn), lambda j, i, k: (0, j))])
        out_specs = tuple(pl.BlockSpec((tm, tn), lambda j, i, k: (i, j))
                          for _ in range(num_names))
        kernel = _make_ktiled_kernel(num_names)
        scratch_shapes = [pltpu.VMEM((num_names, tm, tn), jnp.float32)]
        dims = ("parallel", "parallel", "arbitrary")

    outs = pl.pallas_call(
        kernel,
        out_shape=out_shape,
        grid=grid,
        in_specs=in_specs,
        out_specs=out_specs,
        scratch_shapes=scratch_shapes,
        compiler_params=pltpu.CompilerParams(
            dimension_semantics=dims,
            vmem_limit_bytes=vmem_limit),
        cost_estimate=cost,
    )(*xs_p, w_p, b_p)

    if not isinstance(outs, (tuple, list)):
        outs = (outs,)
    if M_pad != M or N_pad != N:
        outs = [o[:M, :N] for o in outs]
    return list(outs)


class PallasLinear:
    """Synthetic inner model: y = x @ W + b via the fused Pallas kernel."""

    def __init__(self, w, b, out_dtype=jnp.bfloat16):
        self.w = w
        self.b = b
        self.out_dtype = out_dtype
        self._fn = jax.jit(fused_linear_pallas)

    def __call__(self, x):
        return self._fn([x], self.w, self.b)[0]

    def fused(self, xs):
        return self._fn(list(xs), self.w, self.b)


# ---------------------------- VoidModule port ------------------------------ #
class VoidModule:
    """JAX/Pallas port of DeepLOB's VoidModule.

    `model` is any callable tensor -> tensor.  `forward` mutates `tensor_dict`
    in place and returns None, matching the PyTorch semantics.  When all names'
    latest tensors share shape/dtype and the model exposes `.fused`, the
    per-name calls are dispatched as ONE Pallas launch with one input/output
    ref per name (no concatenate copy); row-wise models like Linear are
    invariant to this fusion.
    """

    def __init__(self, model, name_list):
        self.model = model
        self.name_list = name_list

    def forward(self, tensor_dict) -> None:
        latest = [tensor_dict[name][-1] for name in self.name_list]
        fusable = (
            len(latest) > 1
            and hasattr(self.model, "fused")
            and all(t.shape == latest[0].shape and t.dtype == latest[0].dtype
                    for t in latest)
        )
        if fusable:
            outs = self.model.fused(latest)
        else:
            outs = [self.model(t) for t in latest]
        for name, out in zip(self.name_list, outs):
            tensor_dict[name].append(out)
        return None

    __call__ = forward


# --------------------------------- main ------------------------------------ #
if __name__ == "__main__":
    key = jax.random.PRNGKey(0)
    B, D_in, D_out = 128, 128, 128   # per-name batch x features, 2 names

    # Deterministic synthetic inner-model parameters (no checkpoint loading).
    kw, kb, kx1, kx2 = jax.random.split(key, 4)
    w = (jax.random.normal(kw, (D_in, D_out), dtype=jnp.float32) * 0.02
         ).astype(jnp.bfloat16)
    b = jax.random.normal(kb, (1, D_out), dtype=jnp.float32) * 0.02

    inner_model = PallasLinear(w, b)

    # tensor_dict in the documented format: {name: [raw_tensor, ...]}
    x1 = jax.random.normal(kx1, (B, D_in), dtype=jnp.float32).astype(jnp.bfloat16)
    x2 = jax.random.normal(kx2, (B, D_in), dtype=jnp.float32).astype(jnp.bfloat16)
    tensor_dict = {"ask": [x1], "bid": [x2]}

    module = VoidModule(model=inner_model, name_list=["ask", "bid"])

    # Forward: appends model(last_tensor) to each named list, returns None.
    ret = module(tensor_dict)
    assert ret is None

    for name in ["ask", "bid"]:
        assert len(tensor_dict[name]) == 2
        out = jax.block_until_ready(tensor_dict[name][-1]).astype(jnp.float32)
        # Reference of the inner model in f32 (bf16 inputs, f32 accumulate).
        x0 = tensor_dict[name][0].astype(jnp.float32)
        ref = x0 @ w.astype(jnp.float32) + b
        assert out.shape == (B, D_out)
        assert jnp.allclose(out, ref, atol=2e-2, rtol=2e-2)

    # Apply again to show the "after_n computation" chaining behavior.
    # NOTE: chained forwards round each output to bf16 before it becomes the
    # next input, so repeated applications drift slightly from an f32 reference.
    module(tensor_dict)
    jax.block_until_ready(tensor_dict["ask"][-1])
    assert len(tensor_dict["ask"]) == 3 and len(tensor_dict["bid"]) == 3

    print("KERNEL_OK")
</pallas_src>

<mosaic_0001>
module attributes {stable_mosaic.version = 11 : i64} {
  func.func @kernel(%arg0: i32, %arg1: i32, %arg2: memref<64x128xbf16, #tpu.memory_space<vmem>>, %arg3: memref<64x128xbf16, #tpu.memory_space<vmem>>, %arg4: memref<128x128xbf16, #tpu.memory_space<vmem>>, %arg5: memref<1x128xf32, #tpu.memory_space<vmem>>, %arg6: memref<64x128xbf16, #tpu.memory_space<vmem>>, %arg7: memref<64x128xbf16, #tpu.memory_space<vmem>>) attributes {dimension_semantics = [#tpu.dimension_semantics<parallel>, #tpu.dimension_semantics<parallel>], iteration_bounds = array<i64: 1, 2>, scalar_prefetch = 0 : i64, scratch_operands = 0 : i64, tpu.core_type = #tpu.core_type<tc>, window_params = [{transform_indices = @transform_0, window_bounds = array<i64: 64, 128>}, {transform_indices = @transform_1, window_bounds = array<i64: 64, 128>}, {transform_indices = @transform_2, window_bounds = array<i64: 128, 128>}, {transform_indices = @transform_3, window_bounds = array<i64: 1, 128>}, {transform_indices = @transform_4, window_bounds = array<i64: 64, 128>}, {transform_indices = @transform_5, window_bounds = array<i64: 64, 128>}]} {
    %c0 = arith.constant 0 : index
    %c0_0 = arith.constant 0 : index
    %0 = vector.load %arg4[%c0, %c0_0] : memref<128x128xbf16, #tpu.memory_space<vmem>>, vector<128x128xbf16>
    %c0_1 = arith.constant 0 : index
    %c0_2 = arith.constant 0 : index
    %1 = vector.load %arg5[%c0_1, %c0_2] : memref<1x128xf32, #tpu.memory_space<vmem>>, vector<1x128xf32>
    %c0_3 = arith.constant 0 : index
    %c0_4 = arith.constant 0 : index
    %2 = vector.load %arg2[%c0_3, %c0_4] : memref<64x128xbf16, #tpu.memory_space<vmem>>, vector<64x128xbf16>
    %cst = arith.constant dense<0.000000e+00> : vector<64x128xf32>
    %3 = tpu.matmul %2, %0, %cst {dimension_numbers = #tpu.dot_dimension_numbers<[1], [0], [0], [1], [0, 0, 1, 1], [], []>} : vector<64x128xbf16>, vector<128x128xbf16>, vector<64x128xf32> -> vector<64x128xf32>
    %4 = vector.broadcast %1 : vector<1x128xf32> to vector<64x128xf32>
    %5 = arith.addf %3, %4 : vector<64x128xf32>
    %6 = arith.truncf %5 : vector<64x128xf32> to vector<64x128xbf16>
    %c0_5 = arith.constant 0 : index
    %c0_6 = arith.constant 0 : index
    %7 = vector.load %arg6[%c0_5, %c0_6] : memref<64x128xbf16, #tpu.memory_space<vmem>>, vector<64x128xbf16>
    tpu.vector_store %arg6[%c0_5, %c0_6], %6 {strides = array<i32>} : memref<64x128xbf16, #tpu.memory_space<vmem>>, vector<64x128xbf16>,
    %c0_7 = arith.constant 0 : index
    %c0_8 = arith.constant 0 : index
    %8 = vector.load %arg3[%c0_7, %c0_8] : memref<64x128xbf16, #tpu.memory_space<vmem>>, vector<64x128xbf16>
    %cst_9 = arith.constant dense<0.000000e+00> : vector<64x128xf32>
    %9 = tpu.matmul %8, %0, %cst_9 {dimension_numbers = #tpu.dot_dimension_numbers<[1], [0], [0], [1], [0, 0, 1, 1], [], []>} : vector<64x128xbf16>, vector<128x128xbf16>, vector<64x128xf32> -> vector<64x128xf32>
    %10 = vector.broadcast %1 : vector<1x128xf32> to vector<64x128xf32>
    %11 = arith.addf %9, %10 : vector<64x128xf32>
    %12 = arith.truncf %11 : vector<64x128xf32> to vector<64x128xbf16>
    %c0_10 = arith.constant 0 : index
    %c0_11 = arith.constant 0 : index
    %13 = vector.load %arg7[%c0_10, %c0_11] : memref<64x128xbf16, #tpu.memory_space<vmem>>, vector<64x128xbf16>
    tpu.vector_store %arg7[%c0_10, %c0_11], %12 {strides = array<i32>} : memref<64x128xbf16, #tpu.memory_space<vmem>>, vector<64x128xbf16>,
    return
  }
  func.func @transform_0(%arg0: i32, %arg1: i32) -> (i32, i32) {
    %c0_i32 = arith.constant 0 : i32
    %c0_i32_0 = arith.constant 0 : i32
    return %arg1, %c0_i32 : i32, i32
  }
  func.func @transform_1(%arg0: i32, %arg1: i32) -> (i32, i32) {
    %c0_i32 = arith.constant 0 : i32
    %c0_i32_0 = arith.constant 0 : i32
    return %arg1, %c0_i32 : i32, i32
  }
  func.func @transform_2(%arg0: i32, %arg1: i32) -> (i32, i32) {
    %c0_i32 = arith.constant 0 : i32
    %c0_i32_0 = arith.constant 0 : i32
    return %c0_i32, %arg0 : i32, i32
  }
  func.func @transform_3(%arg0: i32, %arg1: i32) -> (i32, i32) {
    %c0_i32 = arith.constant 0 : i32
    %c0_i32_0 = arith.constant 0 : i32
    return %c0_i32, %arg0 : i32, i32
  }
  func.func @transform_4(%arg0: i32, %arg1: i32) -> (i32, i32) {
    %c0_i32 = arith.constant 0 : i32
    return %arg1, %arg0 : i32, i32
  }
  func.func @transform_5(%arg0: i32, %arg1: i32) -> (i32, i32) {
    %c0_i32 = arith.constant 0 : i32
    return %arg1, %arg0 : i32, i32
  }
}

</mosaic_0001>

<bundles_post_ra>
// kernel: fused_linear_pallas.1
= control target key start
LH: loop header
LB: loop body
LE: loop exit
PB: predicated region body
PF: predicated region fallthrough
CT: control target
= control target key end

     0   :  { %s1711_s0 = inlined_call_operand.hbm [shape: bf16[128,128], index: 0, kind: input, shape index: {}]   ;;  %s1712_s1 = inlined_call_operand.hbm [shape: bf16[128,128], index: 1, kind: input, shape index: {}]   ;;  %s1713_s2 = inlined_call_operand.hbm [shape: bf16[128,128], index: 2, kind: input, shape index: {}]   ;;  %s1714_s3 = inlined_call_operand.vmem [shape: f32[1,128], index: 3, kind: input, shape index: {}]   ;;  %s1715_s4 = inlined_call_operand.hbm [shape: bf16[128,128], index: 4, kind: output, shape index: {0}]   ;;  %s1716_s5 = inlined_call_operand.hbm [shape: bf16[128,128], index: 5, kind: output, shape index: {1}]  }
   0x1   :  { %1723 = sst [smem:[#allocation19_spill]] %s1713_s2 }
   0x2   :  { %11 = vsyncpa [#allocation3], 0 }
   0x3   :  { %13 = vsyncpa [#allocation3 + $0x1], 0 }
   0x4   :  { %14 = vsyncpa [#allocation6], 0 }
   0x5   :  { %16 = vsyncpa [#allocation6 + $0x1], 0 }
   0x6   :  { %17 = vsyncpa [#allocation4], 0 }
   0x7   :  { %19 = vsyncpa [#allocation4 + $0x1], 0 }
   0x8   :  { %20 = vsyncpa [#allocation10], 0 }
   0x9   :  { %22 = vsyncpa [#allocation10 + $0x1], 0  ;;  %s1436_s18 = smov 0   ;;  %s1438_s19 = smov 0  }
   0xa   :  { %s1440_s20 = smov 0   ;;  %s1442_s21 = smov 0  }
   0xb   :  { %s1444_s22 = smov 0   ;;  %s1446_s23 = smov 0  }
   0xc LB: > { %1724 = sst [smem:[#allocation16_spill]] %s1391_s22  ;;  %s1467_s24 = sadd.s32 4294967295, %s1395_s23   ;;  %s1395_s23 = sphi %s1446_s23, %s28_s23   ;;  %s1391_s22 = sphi %s1444_s22, %s1742_s22   ;;  %s1387_s21 = sphi %s1442_s21, %s1741_s21   ;;  %s1383_s20 = sphi %s1440_s20, %s1745_s20   ;;  %s1379_s19 = sphi %s1438_s19, %s1744_s19   ;;  %s1375_s18 = sphi %s1436_s18, %s1743_s18  }
   0xd   : > { %s896_s25 = sadd.s32 4294967294, %s1395_s23   ;;  %p60_p0 = scmp.ne.s32.totalorder %s1379_s19, %s1375_s18 }
   0xe   : > { %p61_p1 = scmp.eq.s32.totalorder %s1467_s24, 0  ;;  %p170_p3 = scmp.eq.s32.totalorder %s896_s25, 1 }
   0xf   : > { %p897_p5 = scmp.ge.s32.totalorder %s1395_s23, 1  ;;  %p205_p7 = scmp.lt.s32.totalorder %s1395_s23, 3 }
  0x10   : > { %p1476_p4 = por %p61_p1, %p60_p0  ;;  %p1481_p6 = por %p170_p3, %p60_p0 }
  0x11   : > { %p1486_p8 = pnand %p897_p5, %p205_p7  ;;  %s1397_s29 = smov [#allocation7]  }
  0x12   : > { %s1726_s27 = scalar_select %p1481_p6, 1, 0 }
  0x13   : > { %s219_s30 = sshll.u32 %s1397_s29, 4  ;;  %p1104_p9 = pneg %p1486_p8  ;;  %s220_s30 = int_to_ptr.vmem [resolvable:$true] %s219_s30 }
  0x14   : > { %s37_s7 = sadd.s32 1, %s1391_s22  ;;  %s1206_s8 = scalar_lea.vmem %s220_s30, 1024 }
  0x15   : > { %p1495_p11 = pnand %p1104_p9, %p61_p1  ;;  %p1207_p13 = scmp.ne.s32.totalorder %s220_s30, %s1206_s8 }
  0x16   : > { %p1214_p5 = scmp.lt.s32.totalorder %s220_s30, %s220_s30  ;;  %p1215_p7 = scmp.lt.s32.totalorder %s1206_s8, %s1206_s8 }
  0x17   : > { %p1197_p12 = pneg %p1495_p11 }
  0x18   : > { %p1216_p2 = por %p1215_p7, %p1214_p5 }
  0x19   : > { %p1209_p0 = pnand %p1207_p13, %p1197_p12 }
  0x1b   : > { %p1210_p3 = pneg %p1209_p0 }
  0x1d   : > { %p1217_p6 = pnand %p1216_p2, %p1210_p3 }
  0x1f   : > { %1220 = shalt.err (!%p1217_p6)
}
  0x20   : > { %s1717_s9 = smov 64   ;;  %s1719_s10 = smov 4  }
  0x21   : > { %s1729_s2 = sld [smem:[#allocation19_spill]]  ;;  %p38_p2 = scmp.ge.s32.totalorder %s37_s7, 2 }
  0x22   : > { %s47_s13 = sadd.s32 1, %s1383_s20  ;;  %p54_p6 = scmp.ne.s32.totalorder %s1383_s20, %s1379_s19 }
  0x23   : > { %p55_p9 = scmp.eq.s32.totalorder %s1395_s23, 0  ;;  %s1747_s7 = smov (%p38_p2, %s37_s7), 0 }
  0x24   : > { %1730 = sst [smem:[#allocation17_spill]] %s1747_s7  ;;  %p1732_p13 = scmp.eq.s32.totalorder %s1467_s24, 1 }
  0x25   : > { %p1516_p12 = por %p55_p9, %p54_p6  ;;  %s44_s16 = ssub.s32 %s1391_s22, %s1747_s7 }
  0x26   : > { %p1522_p0 = por %p1732_p13, %p54_p6  ;;  %p1123_p3 = scmp.lt.s32.totalorder %s1395_s23, 2 }
  0x27   : > { %1107 = dma.hbm_to_vmem [thread:$0]  (!%p1495_p11), %s1729_s2, 1024, %s220_s30, [#allocation6], %s1717_s9, %s1717_s9, %s1719_s10  }
  0x28   : > { %p45_p11 = scmp.eq.s32.totalorder %s44_s16, 0  ;;  %s239_s17 = sand.u32 1, %s1383_s20  }
  0x29   : > { %s901_s25 = sshll.u32 %s239_s17, 5  ;;  %s954_s30 = sshll.u32 %s1391_s22, 9 }
  0x2a   : > { %s1531_s29 = scalar_select %p45_p11, %s1383_s20, %s47_s13  }
  0x2b   : > { %s249_s11 = scalar_lea.hbm %s1711_s0, %s954_s30  ;;  %s243_s12 = scalar_lea.vmem [#allocation2], %s901_s25 }
  0x2c   : > { %1734 = sst [smem:[#allocation18_spill]] %s1531_s29  ;;  %s250_s9 = sshll.u32 %s243_s12, 4  ;;  %s251_s9 = int_to_ptr.vmem [resolvable:$true] %s250_s9 }
  0x2d   : > { %p1539_p5 = pnand %p1123_p3, %p1516_p12  ;;  %s1546_s13 = scalar_lea.hbm %s1712_s1, %s954_s30 }
  0x2e   : > { %s264_s16 = scalar_lea.vmem [#allocation5], %s901_s25  ;;  %s240_s29 = scalar_lea.sflag [#allocation3], %s239_s17 }
  0x2f   : > { %s271_s22 = sshll.u32 %s264_s16, 4  ;;  %p1223_p7 = pneg %p1539_p5  ;;  %s272_s22 = int_to_ptr.vmem [resolvable:$true] %s271_s22 }
  0x30   : > { %s1234_s6 = scalar_lea.vmem %s251_s9, 512  ;;  %s1400_s14 = smov [#allocation2]  }
  0x31   : > { %p1235_p2 = scmp.ne.s32.totalorder %s251_s9, %s1234_s6  ;;  %s1239_s8 = sshll.u32 %s1400_s14, 4  ;;  %s1240_s8 = int_to_ptr.vmem [resolvable:$false] %s1239_s8 }
  0x32   : > { %s1241_s12 = scalar_lea.vmem %s1240_s8, 1024  ;;  %p1242_p12 = scmp.lt.s32.totalorder %s251_s9, %s1240_s8 }
  0x33   : > { %p1237_p6 = pnand %p1235_p2, %p1223_p7  ;;  %p1243_p13 = scmp.lt.s32.totalorder %s1241_s12, %s1234_s6 }
  0x35   : > { %p1238_p9 = pneg %p1237_p6  ;;  %p1244_p3 = por %p1243_p13, %p1242_p12 }
  0x37   : > { %p1245_p11 = pnand %p1244_p3, %p1238_p9 }
  0x39   : > { %1248 = shalt.err (!%p1245_p11)
}
  0x3a   : > { %s1736_s2 = smov 4   ;;  %s1737_s7 = smov 64  }
  0x3b   : > { %1111 = dma.hbm_to_vmem [thread:$0]  (!%p1539_p5), %s249_s11, 512, %s251_s9, %s240_s29, %s1737_s7, %s1737_s7, %s1736_s2  }
  0x3c   : > { %s260_s17 = sand.u32 1, %s1395_s23   ;;  %s1262_s30 = scalar_lea.vmem %s272_s22, 512 }
  0x3d   : > { %s261_s25 = scalar_lea.sflag [#allocation6], %s260_s17  ;;  %p1263_p2 = scmp.ne.s32.totalorder %s272_s22, %s1262_s30 }
  0x3e   : > { %s1401_s16 = smov [#allocation5]  }
  0x3f   : > { %p1265_p6 = pnand %p1263_p2, %p1223_p7  ;;  %s1267_s6 = sshll.u32 %s1401_s16, 4  ;;  %s1268_s6 = int_to_ptr.vmem [resolvable:$false] %s1267_s6 }
  0x40   : > { %s1269_s14 = scalar_lea.vmem %s1268_s6, 1024  ;;  %p1270_p9 = scmp.lt.s32.totalorder %s272_s22, %s1268_s6 }
  0x41   : > { %p1266_p10 = pneg %p1265_p6  ;;  %p1271_p12 = scmp.lt.s32.totalorder %s1269_s14, %s1262_s30 }
  0x43   : > { %p1272_p13 = por %p1271_p12, %p1270_p9 }
  0x45   : > { %p1273_p3 = pnand %p1272_p13, %p1266_p10 }
  0x47   : > { %1276 = shalt.err (!%p1273_p3)
}
  0x48   : > { %1114 = dma.hbm_to_vmem [thread:$0]  (!%p1539_p5), %s1546_s13, 512, %s272_s22, %s261_s25, %s1737_s7, %s1737_s7, %s1736_s2  }
  0x49   : > { %283 = sbr.rel (%p1486_p8) target bundleno = 364 (0x16c), region = 36  ;;  %s1571_s9 = sand.u32 (!%p1486_p8), 1, %s1379_s19  }
  0x4a   : > { %s1574_s29 = sshll.u32 (!%p1486_p8), %s1571_s9, 5  ;;  %s286_s11 = scalar_lea.sflag (!%p1486_p8), [#allocation3], %s1571_s9 }
  0x4b   : > { %s1578_s8 = scalar_lea.vmem (!%p1486_p8), [#allocation2], %s1574_s29 }
  0x4e   : > { %1354 = dma.done.wait (%p1476_p4), %s286_s11, 512  }
  0x4f   : > { %1356 = vsyncadd (%p1476_p4), %s286_s11, 4294966784  ;;  %s294_s22 = sand.u32 1, %s1467_s24   ;;  %s1586_s10 = scalar_lea.vmem [#allocation5], %s1574_s29 }
  0x50   : > { %s295_s28 = scalar_lea.sflag [#allocation6], %s294_s22 }
  0x51   : > { %1358 = dma.done.wait (%p1476_p4), %s295_s28, 512  }
  0x52   : > { %1360 = vsyncadd (%p1476_p4), %s295_s28, 4294966784 }
  0x53   : > { %1362 = dma.done.wait (%p61_p1), [#allocation6], 1024  }
  0x54   : > { %1364 = vsyncadd (%p61_p1), [#allocation6], 4294966272  ;;  %v1179_v0 = vld [vmem:[#allocation7 + $0x38] sm:$0xff]   ;;  %v1180_v1 = vld [vmem:[#allocation7 + $0x30] sm:$0xff]   ;;  %s1608_s13 = scalar_lea.vmem [#allocation8], %s1574_s29  ;;  %s1612_s12 = scalar_lea.vmem [#allocation9], %s1574_s29 }
  0x55   : > { %1044 = vmatprep.subr.bf16.mxu0 %v1179_v0  ;;  %1068 = vmatprep.subr.bf16.mxu1 %v1179_v0  ;;  %v1181_v2 = vld [vmem:[#allocation7 + $0x28] sm:$0xff]   ;;  %v1182_v3 = vld [vmem:[#allocation7 + $0x20] sm:$0xff]   ;;  %v1183_v6 = vld [vmem:[#allocation7 + $0x18] sm:$0xff]   ;;  %s715_s2 = sshll.u32 %s1608_s13, 4  ;;  %s732_s7 = sshll.u32 %s1612_s12, 4  ;;  %s1620_s2 = int_to_ptr.vmem [resolvable:$true] %s715_s2  ;;  %s1622_s7 = int_to_ptr.vmem [resolvable:$true] %s732_s7 }
  0x56   : > { %1045 = vmatpush3.bf16.msra.mxu0 %v1179_v0  ;;  %1069 = vmatpush3.bf16.msra.mxu1 %v1179_v0  ;;  %v1187_v4 = vld [vmem:[%s1578_s8] sm:$0xff]   ;;  %v1184_v7 = vld [vmem:[#allocation7 + $0x10] sm:$0xff]   ;;  %v1185_v8 = vld [vmem:[#allocation7 + $0x8] sm:$0xff]   ;;  %s972_s17 = sshll.u32 %s1387_s21, 9  ;;  %s696_s29 = scalar_lea.sflag [#allocation4], %s1571_s9 }
  0x57   : > { %1046 = vmatprep.subr.bf16.mxu0 %v1180_v1  ;;  %1070 = vmatprep.subr.bf16.mxu1 %v1180_v1  ;;  %v1188_v5 = vld [vmem:[%s1586_s10] sm:$0xff]   ;;  %v1189_v10 = vld [vmem:[%s1578_s8 + $0x8] sm:$0xff]   ;;  %v1191_v12 = vld [vmem:[%s1578_s8 + $0x10] sm:$0xff]   ;;  %s1627_s30 = scalar_lea.hbm %s1715_s4, %s972_s17  ;;  %s1634_s14 = scalar_lea.hbm %s1716_s5, %s972_s17 }
  0x58   : > { %1060 = vmatprep.mubr.bf16.mxu0 %v1187_v4  ;;  %1084 = vmatprep.mubr.bf16.mxu1 %v1188_v5  ;;  %v1186_v9 = vld [vmem:[#allocation7] sm:$0xff]   ;;  %v1190_v11 = vld [vmem:[%s1586_s10 + $0x8] sm:$0xff]   ;;  %v1192_v13 = vld [vmem:[%s1586_s10 + $0x10] sm:$0xff]   ;;  %s1277_s11 = scalar_lea.vmem %s1620_s2, 512 }
  0x59   : > { %v1193_v14 = vld [vmem:[%s1578_s8 + $0x18] sm:$0xff]   ;;  %v913_v18 = vld [vmem:[%s1714_s3] ss:$0 sm:$0xff]  ;;  %p1278_p1 = scmp.ne.s32.totalorder %s1620_s2, %s1277_s11  ;;  %s1402_s8 = smov [#allocation8]  }
  0x5a   : > { %1047 = vmatpush3.bf16.msra.mxu0 %v1180_v1  ;;  %1071 = vmatpush3.bf16.msra.mxu1 %v1180_v1  ;;  %v1194_v15 = vld [vmem:[%s1586_s10 + $0x18] sm:$0xff]   ;;  %s1281_s22 = sshll.u32 %s1402_s8, 4  ;;  %s1282_s22 = int_to_ptr.vmem [resolvable:$false] %s1281_s22 }
  0x5b   : > { %1048 = vmatprep.subr.bf16.mxu0 %v1181_v2  ;;  %1072 = vmatprep.subr.bf16.mxu1 %v1181_v2  ;;  %p1279_p4 = pnand %p1278_p1, %p1522_p0  ;;  %s1283_s28 = scalar_lea.vmem %s1282_s22, 1024 }
  0x5c   : > { %p1284_p10 = scmp.lt.s32.totalorder %s1620_s2, %s1282_s22  ;;  %p1285_p5 = scmp.lt.s32.totalorder %s1283_s28, %s1277_s11 }
  0x5d   : > { %p1280_p8 = pneg %p1279_p4 }
  0x5e   : > { %1049 = vmatpush3.bf16.msra.mxu0 %v1181_v2  ;;  %1073 = vmatpush3.bf16.msra.mxu1 %v1181_v2  ;;  %p1286_p7 = por %p1285_p5, %p1284_p10 }
  0x5f   : > { %1050 = vmatprep.subr.bf16.mxu0 %v1182_v3  ;;  %1074 = vmatprep.subr.bf16.mxu1 %v1182_v3 }
  0x60   : > { %p1287_p11 = pnand %p1286_p7, %p1280_p8 }
  0x62   : > { %1051 = vmatpush3.bf16.msra.mxu0 %v1182_v3  ;;  %1075 = vmatpush3.bf16.msra.mxu1 %v1182_v3 }
  0x63   : > { %1052 = vmatprep.subr.bf16.mxu0 %v1183_v6  ;;  %1076 = vmatprep.subr.bf16.mxu1 %v1183_v6 }
  0x66   : > { %1053 = vmatpush3.bf16.msra.mxu0 %v1183_v6  ;;  %1077 = vmatpush3.bf16.msra.mxu1 %v1183_v6 }
  0x67   : > { %1054 = vmatprep.subr.bf16.mxu0 %v1184_v7  ;;  %1078 = vmatprep.subr.bf16.mxu1 %v1184_v7 }
  0x6a   : > { %1055 = vmatpush3.bf16.msra.mxu0 %v1184_v7  ;;  %1079 = vmatpush3.bf16.msra.mxu1 %v1184_v7 }
  0x6b   : > { %1056 = vmatprep.subr.bf16.mxu0 %v1185_v8  ;;  %1080 = vmatprep.subr.bf16.mxu1 %v1185_v8 }
  0x6e   : > { %1057 = vmatpush3.bf16.msra.mxu0 %v1185_v8  ;;  %1081 = vmatpush3.bf16.msra.mxu1 %v1185_v8 }
  0x6f   : > { %1058 = vmatprep.subr.bf16.mxu0 %v1186_v9  ;;  %1082 = vmatprep.subr.bf16.mxu1 %v1186_v9 }
  0x72   : > { %1059 = vmatpush3.bf16.msra.mxu0 %v1186_v9  ;;  %1083 = vmatpush3.bf16.msra.mxu1 %v1186_v9 }
  0x75   : > { %1061 = vmatmul.mubr.bf16.vlgmr.msra.gmra.mxu0 %v1189_v10  ;;  %1085 = vmatmul.mubr.bf16.vlgmr.msra.gmra.mxu1 %v1190_v11 }
  0x76   : > { %1064 = vmatprep.mubr.bf16.mxu0 %v1191_v12  ;;  %1088 = vmatprep.mubr.bf16.mxu1 %v1192_v13 }
  0x7d   : > { %1065 = vmatmul.mubr.bf16.gmra.mxu0 %v1193_v14  ;;  %1089 = vmatmul.mubr.bf16.gmra.mxu1 %v1194_v15 }
 0x135   : > { %v1062_v16 = vpop.f32.mrf.mxu0  ;;  %v1086_v17 = vpop.f32.mrf.mxu1 }
 0x136   : > { %v496_v23 = vadd.f32 %v1062_v16, %v913_v18  ;;  %v633_v24 = vadd.f32 %v1086_v17, %v913_v18 }
 0x137   : > { %v487_v19 = vpop.f32.mrf.mxu0  ;;  %v624_v20 = vpop.f32.mrf.mxu1 }
 0x138   : > { %v488_v27 = vadd.f32 %v913_v18, %v487_v19  ;;  %v625_v28 = vadd.f32 %v913_v18, %v624_v20 }
 0x139   : > { %v1063_v21 = vpop.f32.mrf.mxu0  ;;  %v1087_v22 = vpop.f32.mrf.mxu1 }
 0x13a   : > { %v499_v25 = vadd.f32 %v1063_v21, %v913_v18  ;;  %v636_v26 = vadd.f32 %v1087_v22, %v913_v18 }
 0x13b   : > { %v490_v29 = vpop.f32.mrf.mxu0  ;;  %v627_v30 = vpop.f32.mrf.mxu1 }
 0x13c   : > { %v982_v31 = vpack.c.bf16 %v499_v25, %v496_v23  ;;  %v1002_v32 = vpack.c.bf16 %v636_v26, %v633_v24  ;;  %v491_v33 = vadd.f32 %v913_v18, %v490_v29  ;;  %v628_v34 = vadd.f32 %v913_v18, %v627_v30 }
 0x13d   : > { %v1066_v35 = vpop.f32.mrf.mxu0  ;;  %v1090_v36 = vpop.f32.mrf.mxu1 }
 0x13e   : > { %1014 = vst [vmem:[%s1608_s13 + $0x8] sm:$0xff] %v982_v31   ;;  %1017 = vst [vmem:[%s1612_s12 + $0x8] sm:$0xff] %v1002_v32   ;;  %v977_v37 = vpack.c.bf16 %v491_v33, %v488_v27  ;;  %v997_v38 = vpack.c.bf16 %v628_v34, %v625_v28  ;;  %v512_v43 = vadd.f32 %v1066_v35, %v913_v18 }
 0x13f   : > { %v503_v39 = vpop.f32.mrf.mxu0  ;;  %v640_v40 = vpop.f32.mrf.mxu1  ;;  %v649_v44 = vadd.f32 %v1090_v36, %v913_v18 }
 0x140   : > { %978 = vst [vmem:[%s1608_s13] sm:$0xff] %v977_v37   ;;  %998 = vst [vmem:[%s1612_s12] sm:$0xff] %v997_v38   ;;  %v504_v47 = vadd.f32 %v913_v18, %v503_v39  ;;  %v641_v48 = vadd.f32 %v913_v18, %v640_v40 }
 0x141   : > { %v1067_v41 = vpop.f32.mrf.mxu0  ;;  %v1091_v42 = vpop.f32.mrf.mxu1 }
 0x142   : > { %v515_v45 = vadd.f32 %v1067_v41, %v913_v18  ;;  %v652_v46 = vadd.f32 %v1091_v42, %v913_v18 }
 0x143   : > { %v506_v49 = vpop.f32.mrf.mxu0  ;;  %v643_v50 = vpop.f32.mrf.mxu1 }
 0x144   : > { %v992_v51 = vpack.c.bf16 %v515_v45, %v512_v43  ;;  %v1012_v52 = vpack.c.bf16 %v652_v46, %v649_v44  ;;  %v507_v53 = vadd.f32 %v913_v18, %v506_v49  ;;  %v644_v54 = vadd.f32 %v913_v18, %v643_v50 }
 0x146   : > { %1016 = vst [vmem:[%s1608_s13 + $0x18] sm:$0xff] %v992_v51   ;;  %1019 = vst [vmem:[%s1612_s12 + $0x18] sm:$0xff] %v1012_v52   ;;  %v987_v55 = vpack.c.bf16 %v507_v53, %v504_v47  ;;  %v1007_v56 = vpack.c.bf16 %v644_v54, %v641_v48 }
 0x148   : > { %1015 = vst [vmem:[%s1608_s13 + $0x10] sm:$0xff] %v987_v55   ;;  %1018 = vst [vmem:[%s1612_s12 + $0x10] sm:$0xff] %v1007_v56  }
 0x149   : > { %1290 = shalt.err (!%p1287_p11)
}
 0x14a   : > { %s1291_s10 = scalar_lea.hbm %s1627_s30, 512  ;;  %s1295_s13 = scalar_lea.hbm %s1715_s4, 1024 }
 0x14b   : > { %p1292_p2 = scmp.ne.s32.totalorder %s1627_s30, %s1291_s10  ;;  %p1296_p12 = scmp.lt.s32.totalorder %s1627_s30, %s1715_s4 }
 0x14c   : > { %p1297_p13 = scmp.lt.s32.totalorder %s1295_s13, %s1291_s10 }
 0x14d   : > { %p1293_p6 = pnand %p1292_p2, %p1522_p0 }
 0x14e   : > { %p1298_p3 = por %p1297_p13, %p1296_p12 }
 0x14f   : > { %p1294_p9 = pneg %p1293_p6 }
 0x151   : > { %p1299_p1 = pnand %p1298_p3, %p1294_p9 }
 0x153   : > { %1302 = shalt.err (!%p1299_p1)
}
 0x154   : > { %s1403_s25 = smov 64   ;;  %s1404_s21 = smov 4  }
 0x155   : > { %1100 = dma.vmem_to_hbm [thread:$0]  (%p1522_p0), %s1620_s2, 512, %s1627_s30, %s696_s29, %s1403_s25, %s1403_s25, %s1404_s21  }
 0x156   : > { %s701_s16 = scalar_lea.sflag [#allocation10], %s1571_s9  ;;  %s1303_s6 = scalar_lea.vmem %s1622_s7, 512 }
 0x157   : > { %p1304_p4 = scmp.ne.s32.totalorder %s1622_s7, %s1303_s6  ;;  %s1405_s11 = smov [#allocation9]  }
 0x158   : > { %s1307_s8 = sshll.u32 %s1405_s11, 4  ;;  %s1308_s8 = int_to_ptr.vmem [resolvable:$false] %s1307_s8 }
 0x159   : > { %p1305_p8 = pnand %p1304_p4, %p1522_p0  ;;  %s1309_s22 = scalar_lea.vmem %s1308_s8, 1024 }
 0x15a   : > { %p1310_p5 = scmp.lt.s32.totalorder %s1622_s7, %s1308_s8  ;;  %p1311_p7 = scmp.lt.s32.totalorder %s1309_s22, %s1303_s6 }
 0x15b   : > { %p1306_p10 = pneg %p1305_p8 }
 0x15c   : > { %p1312_p11 = por %p1311_p7, %p1310_p5 }
 0x15e   : > { %p1313_p2 = pnand %p1312_p11, %p1306_p10 }
 0x160   : > { %1316 = shalt.err (!%p1313_p2)
}
 0x161   : > { %s1317_s2 = scalar_lea.hbm %s1634_s14, 512  ;;  %s1321_s29 = scalar_lea.hbm %s1716_s5, 1024 }
 0x162   : > { %p1318_p6 = scmp.ne.s32.totalorder %s1634_s14, %s1317_s2  ;;  %p1322_p13 = scmp.lt.s32.totalorder %s1634_s14, %s1716_s5 }
 0x163   : > { %p1323_p3 = scmp.lt.s32.totalorder %s1321_s29, %s1317_s2 }
 0x164   : > { %p1319_p9 = pnand %p1318_p6, %p1522_p0 }
 0x165   : > { %p1324_p1 = por %p1323_p3, %p1322_p13 }
 0x166   : > { %p1320_p12 = pneg %p1319_p9 }
 0x168   : > { %p1325_p4 = pnand %p1324_p1, %p1320_p12 }
 0x16a   : > { %1328 = shalt.err (!%p1325_p4)
}
 0x16b   : > { %1101 = dma.vmem_to_hbm [thread:$0]  (%p1522_p0), %s1622_s7, 512, %s1634_s14, %s701_s16, %s1403_s25, %s1403_s25, %s1404_s21  }
 0x16c PF: > { %s747_s24 = sand.u32 1, %s1375_s18   ;;  %p1738_p8 = scmp.ne.s32.totalorder %s1726_s27, 0 }
 0x16d   : > { %p1739_p10 = scmp.ge.s32.totalorder %s1395_s23, 2  ;;  %s748_s26 = scalar_lea.sflag [#allocation4], %s747_s24 }
 0x16f   : > { %p1116_p5 = pnand %p1739_p10, %p1738_p8 }
 0x171   : > { %p1117_p7 = pneg %p1116_p5 }
 0x173   : > { %1366 = dma.done.wait (%p1117_p7), %s748_s26, 512  }
 0x174   : > { %1368 = vsyncadd (%p1117_p7), %s748_s26, 4294966784  ;;  %s757_s13 = scalar_lea.sflag [#allocation10], %s747_s24 }
 0x175   : > { %1370 = dma.done.wait (%p1117_p7), %s757_s13, 512  }
 0x176   : > { %1372 = vsyncadd (%p1117_p7), %s757_s13, 4294966784  ;;  %s28_s23 = sadd.s32 1, %s1395_s23   ;;  %s1740_s15 = sld [smem:[#allocation18_spill]] }
 0x177   : > { %p25_p11 = scmp.ge.s32.totalorder %s28_s23, 4   ;;  %s1741_s21 = sld [smem:[#allocation16_spill]] }
 0x178   : > { %s1742_s22 = sld [smem:[#allocation17_spill]]  ;;  %s1743_s18 = smov %s1379_s19 }
 0x179   : > { %s1744_s19 = smov %s1383_s20  ;;  %27 = sbr.rel (!%p25_p11) target bundleno = 12 (0xc), region = 119 }
 0x17c   : > { %s1745_s20 = smov %s1740_s15 }
 0x17e   :  { %762 = vsyncpa [#allocation3], 1 }
 0x17f   :  { %764 = vsyncpa [#allocation3 + $0x1], 1 }
 0x180   :  { %765 = vsyncpa [#allocation6], 1 }
 0x181   :  { %767 = vsyncpa [#allocation6 + $0x1], 1 }
 0x182   :  { %768 = vsyncpa [#allocation4], 1 }
 0x183   :  { %770 = vsyncpa [#allocation4 + $0x1], 1 }
 0x184   :  { %771 = vsyncpa [#allocation10], 1 }
 0x185   :  { %773 = vsyncpa [#allocation10 + $0x1], 1 }

</bundles_post_ra>
